<compile_context>
chip_gen: v5e
topology: v5e:2x2
jax: 0.10.0
libtpu: 0.0.40
codegen_flags: <defaults>
</compile_context>

<pallas_src>
import jax
import jax.numpy as jnp
from jax import lax
from jax.experimental import pallas as pl
from jax.experimental.pallas import tpu as pltpu


# ---------------------------------------------------------------------------
# Kernel
# ---------------------------------------------------------------------------
def _make_kernel(tb: int, M: int, N: int, P: int):
    """Kernel for one batch tile of `tb` elements."""

    def kernel(w_ref, x2_ref, o_ref, x2t_ref):
        # w_ref  : (M, P)       shared weight (constant block index -> fetched once)
        # x2_ref : (tb, M, N)   batch tile of x2
        # o_ref  : (tb, N, M)   batch tile of the output (requires P == N)
        # x2t_ref: (tb*N, M)    VMEM scratch: per-batch transposes, flattened tall

        # Per-batch minor-dim transpose (XLU slot; overlaps with MXU work).
        # Each iteration ends in a ref store, so live ranges stay bounded even
        # though this is a static Python loop.
        for b in range(tb):
            x2t_ref[b * N:(b + 1) * N, :] = x2_ref[b].T

        # First matmul, hoisted: ONE tall (tb*N, M) x (M, P) GEMM.
        v1 = jnp.dot(x2t_ref[...], w_ref[...],
                     preferred_element_type=jnp.float32)            # (tb*N, P)
        # Layout-trivial split of the leading (sublane) dim when N % 8 == 0.
        v1 = v1.reshape(tb, N, P).astype(x2_ref.dtype)              # (tb, N, P)

        # Second matmul: true bmm. Contract the LAST dim of both operands
        # (flash-attention 'bqd,bkd->bqk' pattern) -> x2 is consumed directly,
        # no transpose materialized for this dot.
        v3 = lax.dot_general(
            v1, x2_ref[...],
            dimension_numbers=(((2,), (2,)), ((0,), (0,))),
            preferred_element_type=jnp.float32)                     # (tb, N, M)

        o_ref[...] = v3.astype(o_ref.dtype)

    return kernel


# ---------------------------------------------------------------------------
# VMEM budgeting / batch-tile selection
# ---------------------------------------------------------------------------
def _vmem_capacity_bytes():
    try:
        info = pltpu.get_tpu_info()
        cap = getattr(info, "vmem_capacity_bytes", None)
        if cap:
            return int(cap)
    except Exception:
        pass
    # Conservative fallback: v7x per-TensorCore VMEM.
    return 64 * 1024 * 1024


def _step_bytes(tb, M, N, P, itemsize):
    """Approximate per-grid-step VMEM footprint."""
    w_blk = 2 * M * P * itemsize            # W block (default double-buffered)
    x2_blk = 2 * tb * M * N * itemsize      # x2 block, 2 pipeline buffers
    out_blk = 2 * tb * N * M * itemsize     # out block, 2 pipeline buffers
    x2t = tb * N * M * itemsize             # transpose scratch
    interm = tb * N * (P + M) * 4           # f32 v1 / v3 temporaries
    return w_blk + x2_blk + out_blk + x2t + interm


def _pick_batch_tile(B, M, N, P, itemsize, budget, tb_cap=8):
    """Largest divisor of B (<= tb_cap) fitting `budget`, keeping >= 2 grid steps
    whenever B >= 2 so megacore / multi-TC sharding has work to split."""
    max_tb = min(tb_cap, B if B < 2 else max(1, B // 2))
    best = 1
    for tb in range(1, max_tb + 1):
        if B % tb == 0 and _step_bytes(tb, M, N, P, itemsize) <= budget:
            best = tb
    return best


# ---------------------------------------------------------------------------
# Wrapper (mirrors Model.forward)
# ---------------------------------------------------------------------------
def model_forward(x1, x2, w, *, compute_dtype=None):
    """Mirrors Model.forward(x1, x2). `x1` is unused (traced constant wins)."""
    del x1  # matches torch.jit.trace closure-capture semantics

    B, M, N = x2.shape
    wB, wM, P = w.shape
    assert wB == 1 and wM == M, "weight must be (1, M, P)"
    assert P == N, "bmm requires the inner dims to line up (P == N)"

    if compute_dtype is not None:
        # bf16 operands (f32 accumulation kept via preferred_element_type);
        # useful on v5e where the MXU is bf16-native.
        x2 = x2.astype(compute_dtype)
        w = w.astype(compute_dtype)

    itemsize = jnp.dtype(x2.dtype).itemsize
    cap = _vmem_capacity_bytes()
    budget = cap // 2                       # ~32 MiB on v7x, ~64 MiB on v5e/v6e
    tb = _pick_batch_tile(B, M, N, P, itemsize, budget)
    grid = (B // tb,)

    step_bytes = _step_bytes(tb, M, N, P, itemsize)
    vmem_limit = int(min(cap - 4 * 1024 * 1024,
                         max(budget, int(1.25 * step_bytes) + (1 << 20))))

    flops = 4 * B * M * N * P               # 2 matmuls of 2*N*M*P flops per batch elem
    bytes_accessed = (M * P + B * M * N + B * N * M) * itemsize

    return pl.pallas_call(
        _make_kernel(tb, M, N, P),
        out_shape=jax.ShapeDtypeStruct((B, N, M), x2.dtype),
        grid_spec=pltpu.PrefetchScalarGridSpec(
            num_scalar_prefetch=0,
            grid=grid,
            in_specs=[
                # Constant block index -> Pallas never re-fetches W between steps.
                pl.BlockSpec((M, P), lambda g: (0, 0)),
                pl.BlockSpec((tb, M, N), lambda g: (g, 0, 0)),
            ],
            out_specs=pl.BlockSpec((tb, N, M), lambda g: (g, 0, 0)),
            scratch_shapes=[pltpu.VMEM((tb * N, M), x2.dtype)],
        ),
        compiler_params=pltpu.CompilerParams(
            # Batch tiles are independent -> shard across TensorCores (grid has
            # >= 2 steps whenever B >= 2, see _pick_batch_tile).
            dimension_semantics=("parallel",),
            vmem_limit_bytes=vmem_limit,
        ),
        cost_estimate=pl.CostEstimate(
            flops=flops, transcendentals=0, bytes_accessed=bytes_accessed),
    )(w[0], x2)


def reference_forward(x1, x2, w):
    del x1
    x2t = jnp.transpose(x2, (0, 2, 1))
    wb = jnp.broadcast_to(w, (x2.shape[0],) + w.shape[1:])
    v1 = jnp.einsum("bnm,bmp->bnp", x2t, wb, precision=lax.Precision.HIGHEST)
    return jnp.einsum("bnp,bpm->bnm", v1, x2t, precision=lax.Precision.HIGHEST)


if __name__ == "__main__":
    # Small shapes consistent with the module's (B, D, D) batched-square structure;
    # D=128 keeps the last dims lane-dense (multiple of 128).
    B, D = 4, 128

    key = jax.random.PRNGKey(0)
    k_w, k_x1, k_x2 = jax.random.split(key, 3)

    # Deterministic "parameter": the constant baked into the jit trace (global x1 at __init__).
    w = jax.random.normal(k_w, (1, D, D), dtype=jnp.float32)

    # Forward inputs (x1 is accepted but unused, as in the traced module).
    x1 = jax.random.normal(k_x1, (B, D, D), dtype=jnp.float32)
    x2 = jax.random.normal(k_x2, (B, D, D), dtype=jnp.float32)

    out = jax.block_until_ready(model_forward(x1, x2, w))
    ref = reference_forward(x1, x2, w)

    assert out.shape == (B, D, D)
    # Kernel dots use default MXU precision; reference uses HIGHEST -> allow a
    # small margin (default f32 matmul on TPU is multi-pass bf16).
    rel_err = float(jnp.max(jnp.abs(out - ref)) / (jnp.max(jnp.abs(ref)) + 1e-6))
    assert rel_err < 2e-3, f"mismatch vs. reference (rel err {rel_err:.2e})"

    print("KERNEL_OK")
</pallas_src>

<mosaic_0001>
module attributes {stable_mosaic.version = 11 : i64} {
  func.func @kernel(%arg0: i32, %arg1: memref<128x128xf32, #tpu.memory_space<vmem>>, %arg2: memref<2x128x128xf32, #tpu.memory_space<vmem>>, %arg3: memref<2x128x128xf32, #tpu.memory_space<vmem>>, %arg4: memref<256x128xf32, #tpu.memory_space<vmem>>) attributes {dimension_semantics = [#tpu.dimension_semantics<parallel>], iteration_bounds = array<i64: 2>, scalar_prefetch = 0 : i64, scratch_operands = 1 : i64, tpu.core_type = #tpu.core_type<tc>, window_params = [{pipeline_mode = #tpu.pipeline_mode<synchronous>, transform_indices = @transform_0, window_bounds = array<i64: 128, 128>}, {transform_indices = @transform_1, window_bounds = array<i64: 2, 128, 128>}, {transform_indices = @transform_2, window_bounds = array<i64: 2, 128, 128>}]} {
    %c0 = arith.constant 0 : index
    %c0_0 = arith.constant 0 : index
    %c0_1 = arith.constant 0 : index
    %0 = vector.load %arg2[%c0, %c0_0, %c0_1] : memref<2x128x128xf32, #tpu.memory_space<vmem>>, vector<1x128x128xf32>
    %1 = vector.shape_cast %0 : vector<1x128x128xf32> to vector<128x128xf32>
    %2 = tpu.transpose %1, [1, 0] : vector<128x128xf32> -> vector<128x128xf32>
    %c0_2 = arith.constant 0 : index
    %c0_3 = arith.constant 0 : index
    %3 = vector.load %arg4[%c0_2, %c0_3] : memref<256x128xf32, #tpu.memory_space<vmem>>, vector<128x128xf32>
    tpu.vector_store %arg4[%c0_2, %c0_3], %2 {strides = array<i32>} : memref<256x128xf32, #tpu.memory_space<vmem>>, vector<128x128xf32>,
    %c1 = arith.constant 1 : index
    %c0_4 = arith.constant 0 : index
    %c0_5 = arith.constant 0 : index
    %4 = vector.load %arg2[%c1, %c0_4, %c0_5] : memref<2x128x128xf32, #tpu.memory_space<vmem>>, vector<1x128x128xf32>
    %5 = vector.shape_cast %4 : vector<1x128x128xf32> to vector<128x128xf32>
    %6 = tpu.transpose %5, [1, 0] : vector<128x128xf32> -> vector<128x128xf32>
    %c128 = arith.constant 128 : index
    %c0_6 = arith.constant 0 : index
    %7 = vector.load %arg4[%c128, %c0_6] : memref<256x128xf32, #tpu.memory_space<vmem>>, vector<128x128xf32>
    tpu.vector_store %arg4[%c128, %c0_6], %6 {strides = array<i32>} : memref<256x128xf32, #tpu.memory_space<vmem>>, vector<128x128xf32>,
    %c0_7 = arith.constant 0 : index
    %c0_8 = arith.constant 0 : index
    %8 = vector.load %arg4[%c0_7, %c0_8] : memref<256x128xf32, #tpu.memory_space<vmem>>, vector<256x128xf32>
    %c0_9 = arith.constant 0 : index
    %c0_10 = arith.constant 0 : index
    %9 = vector.load %arg1[%c0_9, %c0_10] : memref<128x128xf32, #tpu.memory_space<vmem>>, vector<128x128xf32>
    %cst = arith.constant dense<0.000000e+00> : vector<256x128xf32>
    %10 = tpu.matmul %8, %9, %cst {dimension_numbers = #tpu.dot_dimension_numbers<[1], [0], [0], [1], [0, 0, 1, 1], [], []>} : vector<256x128xf32>, vector<128x128xf32>, vector<256x128xf32> -> vector<256x128xf32>
    %11 = vector.shape_cast %10 : vector<256x128xf32> to vector<2x128x128xf32>
    %c0_11 = arith.constant 0 : index
    %c0_12 = arith.constant 0 : index
    %c0_13 = arith.constant 0 : index
    %12 = vector.load %arg2[%c0_11, %c0_12, %c0_13] : memref<2x128x128xf32, #tpu.memory_space<vmem>>, vector<2x128x128xf32>
    %cst_14 = arith.constant dense<0.000000e+00> : vector<2x128x128xf32>
    %13 = tpu.matmul %11, %12, %cst_14 {dimension_numbers = #tpu.dot_dimension_numbers<[2], [2], [1], [1], [0, 0, 0, 1, 1, 1], [0], [0]>} : vector<2x128x128xf32>, vector<2x128x128xf32>, vector<2x128x128xf32> -> vector<2x128x128xf32>
    %c0_15 = arith.constant 0 : index
    %c0_16 = arith.constant 0 : index
    %c0_17 = arith.constant 0 : index
    %14 = vector.load %arg3[%c0_15, %c0_16, %c0_17] : memref<2x128x128xf32, #tpu.memory_space<vmem>>, vector<2x128x128xf32>
    tpu.vector_store %arg3[%c0_15, %c0_16, %c0_17], %13 {strides = array<i32>} : memref<2x128x128xf32, #tpu.memory_space<vmem>>, vector<2x128x128xf32>,
    return
  }
  func.func @transform_0(%arg0: i32) -> (i32, i32) {
    %c0_i32 = arith.constant 0 : i32
    %c0_i32_0 = arith.constant 0 : i32
    %c0_i32_1 = arith.constant 0 : i32
    return %c0_i32, %c0_i32_0 : i32, i32
  }
  func.func @transform_1(%arg0: i32) -> (i32, i32, i32) {
    %c0_i32 = arith.constant 0 : i32
    %c0_i32_0 = arith.constant 0 : i32
    %c0_i32_1 = arith.constant 0 : i32
    return %arg0, %c0_i32, %c0_i32_0 : i32, i32, i32
  }
  func.func @transform_2(%arg0: i32) -> (i32, i32, i32) {
    %c0_i32 = arith.constant 0 : i32
    %c0_i32_0 = arith.constant 0 : i32
    %c0_i32_1 = arith.constant 0 : i32
    return %arg0, %c0_i32, %c0_i32_0 : i32, i32, i32
  }
}

</mosaic_0001>

<bundles_post_ra>
// kernel: tpu_custom_call.1
= control target key start
LH: loop header
LB: loop body
LE: loop exit
PB: predicated region body
PF: predicated region fallthrough
CT: control target
= control target key end

     0   :  { %7 = vsyncpa [#allocation4], 0  ;;  %s1381_s0 = inlined_call_operand.hbm [shape: f32[128,128], index: 0, kind: input, shape index: {}]   ;;  %s1382_s1 = inlined_call_operand.hbm [shape: f32[4,128,128], index: 1, kind: input, shape index: {}]   ;;  %s1383_s2 = inlined_call_operand.hbm [shape: f32[4,128,128], index: 2, kind: output, shape index: {}]  }
   0x1   :  { %8 = vsyncpa [#allocation7], 0 }
   0x2   :  { %10 = vsyncpa [#allocation7 + $0x1], 0 }
   0x3   :  { %11 = vsyncpa [#allocation5], 0 }
   0x4   :  { %13 = vsyncpa [#allocation5 + $0x1], 0  ;;  %s1056_s9 = smov 0   ;;  %s1058_s10 = smov 0  }
   0x5   :  { %s1060_s11 = smov 0   ;;  %s1062_s12 = smov 0  }
   0x6 LB: > { %s1077_s13 = sadd.s32 4294967295, %s1034_s12   ;;  %s770_s14 = sadd.s32 4294967294, %s1034_s12   ;;  %s1034_s12 = sphi %s1062_s12, %s1393_s12   ;;  %s1030_s11 = sphi %s1060_s11, %s1392_s11   ;;  %s1026_s10 = sphi %s1058_s10, %s1391_s10   ;;  %s1022_s9 = sphi %s1056_s9, %s1390_s9  }
   0x7   : > { %p60_p0 = scmp.ne.s32.totalorder %s1026_s10, %s1022_s9  ;;  %p61_p1 = scmp.eq.s32.totalorder %s1077_s13, 0 }
   0x8   : > { %p84_p2 = scmp.eq.s32.totalorder %s1077_s13, 1  ;;  %p90_p3 = scmp.eq.s32.totalorder %s770_s14, 1 }
   0x9   : > { %p1086_p4 = por %p61_p1, %p60_p0  ;;  %p771_p5 = scmp.ge.s32.totalorder %s1034_s12, 1 }
   0xa   : > { %p1091_p6 = por %p90_p3, %p60_p0  ;;  %p97_p7 = scmp.lt.s32.totalorder %s1034_s12, 3 }
   0xb   : > { %s108_s19 = sshll.u32 %s1381_s0, 4  ;;  %s1036_s21 = smov [#allocation3]   ;;  %s109_s19 = int_to_ptr.hbm [resolvable:$true] %s108_s19 }
   0xc   : > { %p1099_p8 = pnand %p771_p5, %p97_p7  ;;  %s110_s22 = sshll.u32 %s1036_s21, 4  ;;  %s111_s22 = int_to_ptr.vmem [resolvable:$true] %s110_s22 }
   0xd   : > { %s1109_s23 = sadd.s32 1, %s1034_s12   ;;  %s1037_s24 = smov 128  }
   0xe   : > { %p851_p9 = pneg %p1099_p8  ;;  %s1038_s25 = smov 8  }
   0xf   : > { %s44_s26 = ssub.s32 %s1034_s12, %s1109_s23  ;;  %s47_s27 = sadd.s32 1, %s1030_s11 }
  0x10   : > { %p852_p10 = pnand %p851_p9, %p61_p1  ;;  %p45_p12 = scmp.eq.s32.totalorder %s44_s26, 0 }
  0x11   : > { %p54_p13 = scmp.ne.s32.totalorder %s1030_s11, %s1026_s10  ;;  %p55_p0 = scmp.eq.s32.totalorder %s1034_s12, 0 }
  0x12   : > { %854 = dma.hbm_to_vmem [thread:$0]  (!%p852_p10), %s109_s19, 2048, %s111_s22, [#allocation4], %s1037_s24, %s1037_s24, %s1038_s25  }
  0x13   : > { %s1121_s28 = scalar_select %p45_p12, %s1030_s11, %s47_s27  }
  0x14   : > { %p1125_p3 = por %p84_p2, %p54_p13  ;;  %p864_p5 = scmp.lt.s32.totalorder %s1034_s12, 2 }
  0x15   : > { %s124_s30 = sand.u32 1, %s1030_s11   ;;  %s805_s3 = sshll.u32 %s1034_s12, 8 }
  0x16   : > { %p56_p7 = por %p55_p0, %p54_p13  ;;  %s774_s4 = sshll.u32 %s124_s30, 8 }
  0x17   : > { %s134_s7 = scalar_lea.hbm %s1382_s1, %s805_s3  ;;  %s128_s14 = scalar_lea.vmem [#allocation6], %s774_s4 }
  0x18   : > { %s135_s8 = sshll.u32 %s134_s7, 4  ;;  %s137_s17 = sshll.u32 %s128_s14, 4  ;;  %s136_s8 = int_to_ptr.hbm [resolvable:$true] %s135_s8  ;;  %s138_s17 = int_to_ptr.vmem [resolvable:$true] %s137_s17 }
  0x19   : > { %p1135_p9 = pnand %p864_p5, %p56_p7  ;;  %s125_s19 = scalar_lea.sflag [#allocation7], %s124_s30 }
  0x1a   : > { %s934_s21 = sshra.s32 %s136_s8, 4  ;;  %s941_s3 = scalar_lea.hbm %s1382_s1, 512  ;;  %s935_s21 = int_to_ptr.hbm [resolvable:$true] %s934_s21 }
  0x1b   : > { %s936_s22 = scalar_lea.hbm %s935_s21, 256  ;;  %p938_p10 = pneg %p1135_p9 }
  0x1c   : > { %p937_p2 = scmp.ne.s32.totalorder %s935_s21, %s936_s22  ;;  %p942_p0 = scmp.lt.s32.totalorder %s935_s21, %s1382_s1 }
  0x1d   : > { %p943_p5 = scmp.lt.s32.totalorder %s941_s3, %s936_s22 }
  0x1e   : > { %p939_p12 = pnand %p938_p10, %p937_p2 }
  0x1f   : > { %p944_p7 = por %p943_p5, %p942_p0 }
  0x20   : > { %p940_p13 = pneg %p939_p12 }
  0x22   : > { %p945_p11 = pnand %p944_p7, %p940_p13 }
  0x24   : > { %948 = shalt.err (!%p945_p11)
}
  0x25   : > { %858 = dma.hbm_to_vmem [thread:$0]  (!%p1135_p9), %s136_s8, 4096, %s138_s17, %s125_s19, %s1037_s24, %s1037_s24, %s1038_s25  }
  0x26   : > { %149 = sbr.rel (%p1099_p8) target bundleno = 724 (0x2d4), region = 28 }
  0x2b   : > { %1009 = dma.done.wait (%p61_p1), [#allocation4], 2048  }
  0x2c   : > { %1011 = vsyncadd (%p61_p1), [#allocation4], 4294965248  ;;  %s1159_s30 = sand.u32 1, %s1026_s10  }
  0x2d   : > { %s780_s6 = sshll.u32 %s1159_s30, 8  ;;  %s157_s7 = scalar_lea.sflag [#allocation7], %s1159_s30 }
  0x2e   : > { %s1165_s24 = scalar_lea.vmem [#allocation6], %s780_s6 }
  0x2f   : > { %1013 = dma.done.wait (%p1086_p4), %s157_s7, 4096  }
  0x30   : > { %1015 = vsyncadd (%p1086_p4), %s157_s7, 4294963200  ;;  %v1172_v0 = vld [vmem:[%s1165_s24] sm:$0xff]  ;;  %v1176_v1 = vld [vmem:[%s1165_s24 + $0x8] sm:$0xff]  ;;  %s1313_s15 = scalar_lea.vmem [#allocation8], %s780_s6  ;;  %s807_s20 = sshll.u32 %s1077_s13, 8 }
  0x31   : > { %200 = vxpose.xlu0.b32.start [1/16] %v1172_v0, 128  ;;  %v1180_v2 = vld [vmem:[%s1165_s24 + $0x10] sm:$0xff]  ;;  %v1184_v3 = vld [vmem:[%s1165_s24 + $0x18] sm:$0xff]  ;;  %v1188_v4 = vld [vmem:[%s1165_s24 + $0x20] sm:$0xff]  ;;  %s681_s14 = scalar_lea.hbm %s1383_s2, %s807_s20  ;;  %s682_s17 = sshll.u32 %s1313_s15, 4  ;;  %s683_s17 = int_to_ptr.vmem [resolvable:$true] %s682_s17 }
  0x32   : > { %v1192_v5 = vld [vmem:[%s1165_s24 + $0x28] sm:$0xff]  ;;  %v1196_v6 = vld [vmem:[%s1165_s24 + $0x30] sm:$0xff]  ;;  %v1200_v7 = vld [vmem:[%s1165_s24 + $0x38] sm:$0xff]  ;;  %s684_s18 = sshll.u32 %s681_s14, 4  ;;  %s669_s19 = scalar_lea.sflag [#allocation5], %s1159_s30  ;;  %s685_s18 = int_to_ptr.hbm [resolvable:$true] %s684_s18 }
  0x33   : > { %v1204_v8 = vld [vmem:[%s1165_s24 + $0x40] sm:$0xff]  ;;  %v1208_v9 = vld [vmem:[%s1165_s24 + $0x48] sm:$0xff]  ;;  %v1216_v11 = vld [vmem:[%s1165_s24 + $0x50] sm:$0xff]  ;;  %s978_s21 = sshra.s32 %s685_s18, 4  ;;  %s984_s27 = scalar_lea.hbm %s1383_s2, 512  ;;  %s979_s21 = int_to_ptr.hbm [resolvable:$true] %s978_s21 }
  0x34   : > { %v1212_v10 = vld [vmem:[%s1165_s24 + $0x80] sm:$0xff]  ;;  %v1220_v12 = vld [vmem:[%s1165_s24 + $0x88] sm:$0xff]  ;;  %v1223_v13 = vld [vmem:[%s1165_s24 + $0x78] sm:$0xff]  ;;  %s980_s22 = scalar_lea.hbm %s979_s21, 256  ;;  %p985_p11 = scmp.lt.s32.totalorder %s979_s21, %s1383_s2 }
  0x35   : > { %265 = vxpose.xlu1.b32.start [1/16] %v1212_v10, 128  ;;  %506 = vmatpush.xpose.msra.mxu1 %v1223_v13  ;;  %v1228_v14 = vld [vmem:[%s1165_s24 + $0x70] sm:$0xff]  ;;  %v1231_v15 = vld [vmem:[%s1165_s24 + $0x58] sm:$0xff]  ;;  %v1239_v18 = vld [vmem:[%s1165_s24 + $0x68] sm:$0xff]  ;;  %p981_p1 = scmp.ne.s32.totalorder %s979_s21, %s980_s22  ;;  %p986_p9 = scmp.lt.s32.totalorder %s984_s27, %s980_s22 }
  0x36   : > { %v1236_v16 = vld [vmem:[%s1165_s24 + $0x90] sm:$0xff]  ;;  %v360_v17 = vld [vmem:[#allocation3 + $0x78] sm:$0xff]  ;;  %v358_v20 = vld [vmem:[#allocation3 + $0x68] sm:$0xff] }
  0x37   : > { %361 = vmatpush.msra.mxu0 %v360_v17  ;;  %v359_v19 = vld [vmem:[#allocation3 + $0x70] sm:$0xff]  ;;  %808 = vmatpush.msra.mxu3 %v360_v17  ;;  %v357_v21 = vld [vmem:[#allocation3 + $0x60] sm:$0xff]  ;;  %v1247_v23 = vld [vmem:[%s1165_s24 + $0x98] sm:$0xff]  ;;  %p982_p4 = pnand %p981_p1, %p1125_p3  ;;  %p987_p2 = por %p986_p9, %p985_p11 }
  0x38   : > { %v1244_v22 = vld [vmem:[%s1165_s24 + $0x60] sm:$0xff]  ;;  %v356_v24 = vld [vmem:[#allocation3 + $0x58] sm:$0xff]  ;;  %v355_v25 = vld [vmem:[#allocation3 + $0x50] sm:$0xff] }
  0x39   : > { %201 = vxpose.xlu0.b32.cont [2/16] %v1176_v1, 128  ;;  %507 = vmatpush.xpose.msra.mxu1 %v1228_v14  ;;  %v354_v26 = vld [vmem:[#allocation3 + $0x48] sm:$0xff]  ;;  %v353_v27 = vld [vmem:[#allocation3 + $0x40] sm:$0xff]  ;;  %v352_v29 = vld [vmem:[#allocation3 + $0x38] sm:$0xff]  ;;  %p983_p8 = pneg %p982_p4 }
  0x3a   : > { %362 = vmatpush.msra.mxu0 %v359_v19  ;;  %809 = vmatpush.msra.mxu3 %v359_v19  ;;  %v1254_v28 = vld [vmem:[%s1165_s24 + $0xa0] sm:$0xff]  ;;  %v351_v30 = vld [vmem:[#allocation3 + $0x30] sm:$0xff]  ;;  %v350_v31 = vld [vmem:[#allocation3 + $0x28] sm:$0xff] }
  0x3b   : > { %v349_v32 = vld [vmem:[#allocation3 + $0x20] sm:$0xff]  ;;  %v1261_v33 = vld [vmem:[%s1165_s24 + $0xa8] sm:$0xff]  ;;  %v348_v34 = vld [vmem:[#allocation3 + $0x18] sm:$0xff]  ;;  %p988_p10 = pnand %p987_p2, %p983_p8 }
  0x3c   : > { %363 = vmatpush.msra.mxu0 %v358_v20  ;;  %810 = vmatpush.msra.mxu3 %v358_v20  ;;  %v347_v35 = vld [vmem:[#allocation3 + $0x10] sm:$0xff]  ;;  %v346_v36 = vld [vmem:[#allocation3 + $0x8] sm:$0xff]  ;;  %v345_v37 = vld [vmem:[#allocation3] sm:$0xff] }
  0x3d   : > { %266 = vxpose.xlu1.b32.cont [2/16] %v1220_v12, 128  ;;  %508 = vmatpush.xpose.msra.mxu1 %v1239_v18  ;;  %v1268_v38 = vld [vmem:[%s1165_s24 + $0xb0] sm:$0xff]  ;;  %v789_v39 = vld [vmem:[%s1165_s24 + $0xb8] sm:$0xff]  ;;  %v790_v40 = vld [vmem:[%s1165_s24 + $0xc0] sm:$0xff] }
  0x3e   : > { %364 = vmatpush.msra.mxu0 %v357_v21  ;;  %811 = vmatpush.msra.mxu3 %v357_v21  ;;  %v791_v41 = vld [vmem:[%s1165_s24 + $0xc8] sm:$0xff]  ;;  %v792_v42 = vld [vmem:[%s1165_s24 + $0xd0] sm:$0xff]  ;;  %v793_v44 = vld [vmem:[%s1165_s24 + $0xd8] sm:$0xff] }
  0x3f   : > { %v794_v46 = vld [vmem:[%s1165_s24 + $0xe0] sm:$0xff]  ;;  %v795_v48 = vld [vmem:[%s1165_s24 + $0xe8] sm:$0xff]  ;;  %v796_v50 = vld [vmem:[%s1165_s24 + $0xf0] sm:$0xff] }
  0x40   : > { %365 = vmatpush.msra.mxu0 %v356_v24  ;;  %812 = vmatpush.msra.mxu3 %v356_v24  ;;  %v797_v52 = vld [vmem:[%s1165_s24 + $0xf8] sm:$0xff] }
  0x41   : > { %202 = vxpose.xlu0.b32.cont [3/16] %v1180_v2, 128  ;;  %509 = vmatpush.xpose.msra.mxu1 %v1244_v22 }
  0x42   : > { %366 = vmatpush.msra.mxu0 %v355_v25  ;;  %813 = vmatpush.msra.mxu3 %v355_v25 }
  0x43   : > { %571 = vmatpush.xpose.msra.mxu2 %v797_v52 }
  0x44   : > { %367 = vmatpush.msra.mxu0 %v354_v26  ;;  %814 = vmatpush.msra.mxu3 %v354_v26 }
  0x45   : > { %267 = vxpose.xlu1.b32.cont [3/16] %v1236_v16, 128  ;;  %510 = vmatpush.xpose.msra.mxu1 %v1231_v15 }
  0x46   : > { %368 = vmatpush.msra.mxu0 %v353_v27  ;;  %815 = vmatpush.msra.mxu3 %v353_v27 }
  0x47   : > { %572 = vmatpush.xpose.msra.mxu2 %v796_v50 }
  0x48   : > { %369 = vmatpush.msra.mxu0 %v352_v29  ;;  %816 = vmatpush.msra.mxu3 %v352_v29 }
  0x49   : > { %203 = vxpose.xlu0.b32.cont [4/16] %v1184_v3, 128  ;;  %511 = vmatpush.xpose.msra.mxu1 %v1216_v11 }
  0x4a   : > { %370 = vmatpush.msra.mxu0 %v351_v30  ;;  %817 = vmatpush.msra.mxu3 %v351_v30 }
  0x4b   : > { %573 = vmatpush.xpose.msra.mxu2 %v795_v48 }
  0x4c   : > { %371 = vmatpush.msra.mxu0 %v350_v31  ;;  %818 = vmatpush.msra.mxu3 %v350_v31 }
  0x4d   : > { %268 = vxpose.xlu1.b32.cont [4/16] %v1247_v23, 128  ;;  %512 = vmatpush.xpose.msra.mxu1 %v1208_v9 }
  0x4e   : > { %372 = vmatpush.msra.mxu0 %v349_v32  ;;  %819 = vmatpush.msra.mxu3 %v349_v32 }
  0x4f   : > { %574 = vmatpush.xpose.msra.mxu2 %v794_v46 }
  0x50   : > { %373 = vmatpush.msra.mxu0 %v348_v34  ;;  %820 = vmatpush.msra.mxu3 %v348_v34 }
  0x51   : > { %204 = vxpose.xlu0.b32.cont [5/16] %v1188_v4, 128  ;;  %513 = vmatpush.xpose.msra.mxu1 %v1204_v8 }
  0x52   : > { %374 = vmatpush.msra.mxu0 %v347_v35  ;;  %821 = vmatpush.msra.mxu3 %v347_v35 }
  0x53   : > { %575 = vmatpush.xpose.msra.mxu2 %v793_v44 }
  0x54   : > { %375 = vmatpush.msra.mxu0 %v346_v36  ;;  %822 = vmatpush.msra.mxu3 %v346_v36 }
  0x55   : > { %269 = vxpose.xlu1.b32.cont [5/16] %v1254_v28, 128  ;;  %514 = vmatpush.xpose.msra.mxu1 %v1200_v7 }
  0x56   : > { %376 = vmatpush.msra.mxu0 %v345_v37  ;;  %823 = vmatpush.msra.mxu3 %v345_v37 }
  0x57   : > { %576 = vmatpush.xpose.msra.mxu2 %v792_v42 }
  0x58   : > { %824 = vmatpush.xpose.msrb.mxu3 %v1223_v13 }
  0x59   : > { %205 = vxpose.xlu0.b32.cont [6/16] %v1192_v5, 128  ;;  %515 = vmatpush.xpose.msra.mxu1 %v1196_v6 }
  0x5b   : > { %577 = vmatpush.xpose.msra.mxu2 %v791_v41 }
  0x5c   : > { %825 = vmatpush.xpose.msrb.mxu3 %v1228_v14 }
  0x5d   : > { %270 = vxpose.xlu1.b32.cont [6/16] %v1261_v33, 128  ;;  %516 = vmatpush.xpose.msra.mxu1 %v1192_v5 }
  0x5f   : > { %578 = vmatpush.xpose.msra.mxu2 %v790_v40 }
  0x60   : > { %826 = vmatpush.xpose.msrb.mxu3 %v1239_v18 }
  0x61   : > { %206 = vxpose.xlu0.b32.cont [7/16] %v1196_v6, 128  ;;  %517 = vmatpush.xpose.msra.mxu1 %v1188_v4 }
  0x63   : > { %579 = vmatpush.xpose.msra.mxu2 %v789_v39 }
  0x64   : > { %827 = vmatpush.xpose.msrb.mxu3 %v1244_v22 }
  0x65   : > { %271 = vxpose.xlu1.b32.cont [7/16] %v1268_v38, 128  ;;  %518 = vmatpush.xpose.msra.mxu1 %v1184_v3 }
  0x67   : > { %580 = vmatpush.xpose.msra.mxu2 %v1268_v38 }
  0x68   : > { %828 = vmatpush.xpose.msrb.mxu3 %v1231_v15 }
  0x69   : > { %207 = vxpose.xlu0.b32.cont [8/16] %v1200_v7, 128  ;;  %519 = vmatpush.xpose.msra.mxu1 %v1180_v2 }
  0x6b   : > { %581 = vmatpush.xpose.msra.mxu2 %v1261_v33 }
  0x6c   : > { %829 = vmatpush.xpose.msrb.mxu3 %v1216_v11 }
  0x6d   : > { %272 = vxpose.xlu1.b32.cont [8/16] %v789_v39, 128  ;;  %520 = vmatpush.xpose.msra.mxu1 %v1176_v1 }
  0x6f   : > { %582 = vmatpush.xpose.msra.mxu2 %v1254_v28 }
  0x70   : > { %830 = vmatpush.xpose.msrb.mxu3 %v1208_v9 }
  0x71   : > { %208 = vxpose.xlu0.b32.cont [9/16] %v1204_v8, 128  ;;  %521 = vmatpush.xpose.msra.mxu1 %v1172_v0 }
  0x73   : > { %583 = vmatpush.xpose.msra.mxu2 %v1247_v23 }
  0x74   : > { %831 = vmatpush.xpose.msrb.mxu3 %v1204_v8 }
  0x75   : > { %273 = vxpose.xlu1.b32.cont [9/16] %v790_v40, 128 }
  0x77   : > { %584 = vmatpush.xpose.msra.mxu2 %v1236_v16 }
  0x78   : > { %832 = vmatpush.xpose.msrb.mxu3 %v1200_v7 }
  0x79   : > { %209 = vxpose.xlu0.b32.cont [10/16] %v1208_v9, 128 }
  0x7b   : > { %585 = vmatpush.xpose.msra.mxu2 %v1220_v12 }
  0x7c   : > { %833 = vmatpush.xpose.msrb.mxu3 %v1196_v6 }
  0x7d   : > { %274 = vxpose.xlu1.b32.cont [10/16] %v791_v41, 128 }
  0x7f   : > { %586 = vmatpush.xpose.msra.mxu2 %v1212_v10 }
  0x80   : > { %834 = vmatpush.xpose.msrb.mxu3 %v1192_v5 }
  0x81   : > { %210 = vxpose.xlu0.b32.cont [11/16] %v1216_v11, 128 }
  0x84   : > { %835 = vmatpush.xpose.msrb.mxu3 %v1188_v4 }
  0x85   : > { %275 = vxpose.xlu1.b32.cont [11/16] %v792_v42, 128 }
  0x88   : > { %836 = vmatpush.xpose.msrb.mxu3 %v1184_v3 }
  0x89   : > { %211 = vxpose.xlu0.b32.cont [12/16] %v1231_v15, 128 }
  0x8c   : > { %837 = vmatpush.xpose.msrb.mxu3 %v1180_v2 }
  0x8d   : > { %276 = vxpose.xlu1.b32.cont [12/16] %v793_v44, 128 }
  0x90   : > { %838 = vmatpush.xpose.msrb.mxu3 %v1176_v1 }
  0x91   : > { %212 = vxpose.xlu0.b32.cont [13/16] %v1244_v22, 128 }
  0x94   : > { %839 = vmatpush.xpose.msrb.mxu3 %v1172_v0 }
  0x95   : > { %277 = vxpose.xlu1.b32.cont [13/16] %v794_v46, 128 }
  0x99   : > { %213 = vxpose.xlu0.b32.cont [14/16] %v1239_v18, 128 }
  0x9d   : > { %278 = vxpose.xlu1.b32.cont [14/16] %v795_v48, 128 }
  0xa1   : > { %214 = vxpose.xlu0.b32.cont [15/16] %v1228_v14, 128 }
  0xa5   : > { %279 = vxpose.xlu1.b32.cont [15/16] %v796_v50, 128 }
  0xa9   : > { %215 = vxpose.xlu0.b32.end [16/16] %v1223_v13, 128 }
  0xad   : > { %280 = vxpose.xlu1.b32.end [16/16] %v797_v52, 128 }
  0xd5   : > { %v216_v43 = vpop.trf.xlu0 }
  0xd6   : > { %377 = vmatmul.f32.vlgmr.msra.gmra.mxu0 %v216_v43 }
  0xd9   : > { %v281_v58 = vpop.trf.xlu1 }
  0xdd   : > { %v217_v45 = vpop.trf.xlu0 }
  0xde   : > { %380 = vmatmul.f32.gmra.mxu0 %v217_v45 }
  0xe1   : > { %v282_v60 = vpop.trf.xlu1 }
  0xe5   : > { %v218_v47 = vpop.trf.xlu0 }
  0xe6   : > { %383 = vmatmul.f32.gmra.mxu0 %v218_v47 }
  0xe9   : > { %v283_v62 = vpop.trf.xlu1 }
  0xea   : > { %431 = vmatmul.f32.vlgmr.msra.gmra.mxu3 %v283_v62 }
  0xed   : > { %v219_v49 = vpop.trf.xlu0 }
  0xee   : > { %386 = vmatmul.f32.gmra.mxu0 %v219_v49 }
  0xf1   : > { %v284_v0 = vpop.trf.xlu1 }
  0xf2   : > { %434 = vmatmul.f32.gmra.mxu3 %v284_v0 }
  0xf5   : > { %v220_v51 = vpop.trf.xlu0 }
  0xf6   : > { %389 = vmatmul.f32.gmra.mxu0 %v220_v51 }
  0xf9   : > { %v285_v2 = vpop.trf.xlu1 }
  0xfa   : > { %437 = vmatmul.f32.gmra.mxu3 %v285_v2 }
  0xfd   : > { %v221_v53 = vpop.trf.xlu0 }
  0xfe   : > { %392 = vmatmul.f32.gmra.mxu0 %v221_v53 }
 0x101   : > { %v286_v4 = vpop.trf.xlu1 }
 0x102   : > { %440 = vmatmul.f32.gmra.mxu3 %v286_v4 }
 0x105   : > { %v222_v54 = vpop.trf.xlu0 }
 0x106   : > { %395 = vmatmul.f32.gmra.mxu0 %v222_v54 }
 0x109   : > { %v287_v7 = vpop.trf.xlu1 }
 0x10a   : > { %443 = vmatmul.f32.gmra.mxu3 %v287_v7 }
 0x10d   : > { %v223_v55 = vpop.trf.xlu0 }
 0x10e   : > { %398 = vmatmul.f32.gmra.mxu0 %v223_v55 }
 0x111   : > { %v288_v9 = vpop.trf.xlu1 }
 0x112   : > { %446 = vmatmul.f32.gmra.mxu3 %v288_v9 }
 0x115   : > { %v224_v56 = vpop.trf.xlu0 }
 0x116   : > { %401 = vmatmul.f32.gmra.mxu0 %v224_v56 }
 0x119   : > { %v289_v11 = vpop.trf.xlu1 }
 0x11a   : > { %449 = vmatmul.f32.gmra.mxu3 %v289_v11 }
 0x11d   : > { %v225_v57 = vpop.trf.xlu0 }
 0x11e   : > { %404 = vmatmul.f32.gmra.mxu0 %v225_v57 }
 0x121   : > { %v290_v13 = vpop.trf.xlu1 }
 0x122   : > { %452 = vmatmul.f32.gmra.mxu3 %v290_v13 }
 0x125   : > { %v226_v59 = vpop.trf.xlu0 }
 0x126   : > { %407 = vmatmul.f32.gmra.mxu0 %v226_v59 }
 0x129   : > { %v291_v15 = vpop.trf.xlu1 }
 0x12a   : > { %455 = vmatmul.f32.gmra.mxu3 %v291_v15 }
 0x12d   : > { %v227_v61 = vpop.trf.xlu0 }
 0x12e   : > { %410 = vmatmul.f32.gmra.mxu0 %v227_v61 }
 0x131   : > { %v292_v17 = vpop.trf.xlu1 }
 0x132   : > { %458 = vmatmul.f32.gmra.mxu3 %v292_v17 }
 0x135   : > { %v228_v63 = vpop.trf.xlu0 }
 0x136   : > { %413 = vmatmul.f32.gmra.mxu0 %v228_v63 }
 0x139   : > { %v293_v19 = vpop.trf.xlu1 }
 0x13a   : > { %461 = vmatmul.f32.gmra.mxu3 %v293_v19 }
 0x13d   : > { %v229_v1 = vpop.trf.xlu0 }
 0x13e   : > { %416 = vmatmul.f32.gmra.mxu0 %v229_v1 }
 0x141   : > { %v294_v21 = vpop.trf.xlu1 }
 0x142   : > { %464 = vmatmul.f32.gmra.mxu3 %v294_v21 }
 0x145   : > { %v230_v3 = vpop.trf.xlu0 }
 0x146   : > { %419 = vmatmul.f32.gmra.mxu0 %v230_v3 }
 0x149   : > { %v295_v23 = vpop.trf.xlu1 }
 0x14a   : > { %467 = vmatmul.f32.gmra.mxu3 %v295_v23 }
 0x14d   : > { %v231_v5 = vpop.trf.xlu0 }
 0x14e   : > { %422 = vmatmul.f32.gmra.mxu0 %v231_v5 }
 0x151   : > { %v296_v25 = vpop.trf.xlu1 }
 0x152   : > { %470 = vmatmul.f32.gmra.mxu3 %v296_v25 }
 0x153   : > { %v378_v6 = vpop.f32.mrf.mxu0 }
 0x154   : > { %522 = vmatmul.f32.vlgmr.msra.gmra.mxu1 %v378_v6 }
 0x156   : > { %425 = vmatmul.f32.gmra.mxu0 %v281_v58 }
 0x15b   : > { %v381_v8 = vpop.f32.mrf.mxu0 }
 0x15c   : > { %525 = vmatmul.f32.gmra.mxu1 %v381_v8 }
 0x15e   : > { %428 = vmatmul.f32.gmra.mxu0 %v282_v60 }
 0x163   : > { %v384_v10 = vpop.f32.mrf.mxu0 }
 0x164   : > { %528 = vmatmul.f32.gmra.mxu1 %v384_v10 }
 0x16b   : > { %v387_v12 = vpop.f32.mrf.mxu0 }
 0x16c   : > { %531 = vmatmul.f32.gmra.mxu1 %v387_v12 }
 0x16d   : > { %v432_v30 = vpop.f32.mrf.mxu3 }
 0x173   : > { %v390_v14 = vpop.f32.mrf.mxu0 }
 0x174   : > { %534 = vmatmul.f32.gmra.mxu1 %v390_v14 }
 0x175   : > { %v435_v32 = vpop.f32.mrf.mxu3 }
 0x17b   : > { %v393_v16 = vpop.f32.mrf.mxu0 }
 0x17c   : > { %537 = vmatmul.f32.gmra.mxu1 %v393_v16 }
 0x17d   : > { %v438_v34 = vpop.f32.mrf.mxu3 }
 0x183   : > { %v396_v18 = vpop.f32.mrf.mxu0 }
 0x184   : > { %540 = vmatmul.f32.gmra.mxu1 %v396_v18 }
 0x185   : > { %v441_v38 = vpop.f32.mrf.mxu3 }
 0x18b   : > { %v399_v20 = vpop.f32.mrf.mxu0 }
 0x18c   : > { %543 = vmatmul.f32.gmra.mxu1 %v399_v20 }
 0x18d   : > { %v444_v41 = vpop.f32.mrf.mxu3 }
 0x193   : > { %v402_v22 = vpop.f32.mrf.mxu0 }
 0x194   : > { %546 = vmatmul.f32.gmra.mxu1 %v402_v22 }
 0x195   : > { %v447_v43 = vpop.f32.mrf.mxu3 }
 0x19b   : > { %v405_v24 = vpop.f32.mrf.mxu0 }
 0x19c   : > { %549 = vmatmul.f32.gmra.mxu1 %v405_v24 }
 0x19d   : > { %v450_v45 = vpop.f32.mrf.mxu3 }
 0x1a3   : > { %v408_v26 = vpop.f32.mrf.mxu0 }
 0x1a4   : > { %552 = vmatmul.f32.gmra.mxu1 %v408_v26 }
 0x1a5   : > { %v453_v48 = vpop.f32.mrf.mxu3 }
 0x1ab   : > { %v411_v27 = vpop.f32.mrf.mxu0 }
 0x1ac   : > { %555 = vmatmul.f32.gmra.mxu1 %v411_v27 }
 0x1ad   : > { %v456_v50 = vpop.f32.mrf.mxu3 }
 0x1b3   : > { %v414_v28 = vpop.f32.mrf.mxu0 }
 0x1b4   : > { %558 = vmatmul.f32.gmra.mxu1 %v414_v28 }
 0x1b5   : > { %v459_v52 = vpop.f32.mrf.mxu3 }
 0x1bb   : > { %v417_v29 = vpop.f32.mrf.mxu0 }
 0x1bc   : > { %561 = vmatmul.f32.gmra.mxu1 %v417_v29 }
 0x1bd   : > { %v462_v54 = vpop.f32.mrf.mxu3 }
 0x1c3   : > { %v420_v31 = vpop.f32.mrf.mxu0 }
 0x1c4   : > { %564 = vmatmul.f32.vlgmr.msrb.gmra.mxu3 %v420_v31 }
 0x1c5   : > { %v465_v57 = vpop.f32.mrf.mxu3 }
 0x1cb   : > { %v423_v33 = vpop.f32.mrf.mxu0 }
 0x1cc   : > { %567 = vmatmul.f32.gmra.mxu3 %v423_v33 }
 0x1cd   : > { %v468_v59 = vpop.f32.mrf.mxu3 }
 0x1d1   : > { %v523_v35 = vpop.f32.mrf.mxu1 }
 0x1d2   : > { %636 = vst [vmem:[%s1313_s15] sm:$0xff] %v523_v35 }
 0x1d3   : > { %v426_v36 = vpop.f32.mrf.mxu0 }
 0x1d4   : > { %587 = vmatmul.f32.vlgmr.msra.gmra.mxu2 %v426_v36 }
 0x1d5   : > { %v471_v61 = vpop.f32.mrf.mxu3 }
 0x1d9   : > { %v526_v37 = vpop.f32.mrf.mxu1 }
 0x1da   : > { %637 = vst [vmem:[%s1313_s15 + $0x8] sm:$0xff] %v526_v37 }
 0x1db   : > { %v429_v39 = vpop.f32.mrf.mxu0 }
 0x1dc   : > { %590 = vmatmul.f32.gmra.mxu2 %v429_v39 }
 0x1e1   : > { %v529_v40 = vpop.f32.mrf.mxu1 }
 0x1e2   : > { %638 = vst [vmem:[%s1313_s15 + $0x10] sm:$0xff] %v529_v40 }
 0x1e4   : > { %593 = vmatmul.f32.gmra.mxu2 %v432_v30 }
 0x1e9   : > { %v532_v42 = vpop.f32.mrf.mxu1 }
 0x1ea   : > { %639 = vst [vmem:[%s1313_s15 + $0x18] sm:$0xff] %v532_v42 }
 0x1ec   : > { %596 = vmatmul.f32.gmra.mxu2 %v435_v32 }
 0x1f1   : > { %v535_v44 = vpop.f32.mrf.mxu1 }
 0x1f2   : > { %640 = vst [vmem:[%s1313_s15 + $0x20] sm:$0xff] %v535_v44 }
 0x1f4   : > { %599 = vmatmul.f32.gmra.mxu2 %v438_v34 }
 0x1f9   : > { %v538_v46 = vpop.f32.mrf.mxu1 }
 0x1fa   : > { %641 = vst [vmem:[%s1313_s15 + $0x28] sm:$0xff] %v538_v46 }
 0x1fc   : > { %602 = vmatmul.f32.gmra.mxu2 %v441_v38 }
 0x201   : > { %v541_v47 = vpop.f32.mrf.mxu1 }
 0x202   : > { %642 = vst [vmem:[%s1313_s15 + $0x30] sm:$0xff] %v541_v47 }
 0x204   : > { %605 = vmatmul.f32.gmra.mxu2 %v444_v41 }
 0x209   : > { %v544_v49 = vpop.f32.mrf.mxu1 }
 0x20a   : > { %643 = vst [vmem:[%s1313_s15 + $0x38] sm:$0xff] %v544_v49 }
 0x20c   : > { %608 = vmatmul.f32.gmra.mxu2 %v447_v43 }
 0x211   : > { %v547_v51 = vpop.f32.mrf.mxu1 }
 0x212   : > { %644 = vst [vmem:[%s1313_s15 + $0x40] sm:$0xff] %v547_v51 }
 0x214   : > { %611 = vmatmul.f32.gmra.mxu2 %v450_v45 }
 0x219   : > { %v550_v53 = vpop.f32.mrf.mxu1 }
 0x21a   : > { %645 = vst [vmem:[%s1313_s15 + $0x48] sm:$0xff] %v550_v53 }
 0x21c   : > { %614 = vmatmul.f32.gmra.mxu2 %v453_v48 }
 0x221   : > { %v553_v55 = vpop.f32.mrf.mxu1 }
 0x222   : > { %646 = vst [vmem:[%s1313_s15 + $0x50] sm:$0xff] %v553_v55 }
 0x224   : > { %617 = vmatmul.f32.gmra.mxu2 %v456_v50 }
 0x229   : > { %v556_v56 = vpop.f32.mrf.mxu1 }
 0x22a   : > { %647 = vst [vmem:[%s1313_s15 + $0x58] sm:$0xff] %v556_v56 }
 0x22c   : > { %620 = vmatmul.f32.gmra.mxu2 %v459_v52 }
 0x231   : > { %v559_v58 = vpop.f32.mrf.mxu1 }
 0x232   : > { %648 = vst [vmem:[%s1313_s15 + $0x60] sm:$0xff] %v559_v58 }
 0x234   : > { %623 = vmatmul.f32.gmra.mxu2 %v462_v54 }
 0x239   : > { %v562_v60 = vpop.f32.mrf.mxu1 }
 0x23a   : > { %649 = vst [vmem:[%s1313_s15 + $0x68] sm:$0xff] %v562_v60 }
 0x23c   : > { %626 = vmatmul.f32.gmra.mxu2 %v465_v57 }
 0x244   : > { %629 = vmatmul.f32.gmra.mxu2 %v468_v59 }
 0x247   : > { %v565_v62 = vpop.f32.mrf.mxu3 }
 0x248   : > { %650 = vst [vmem:[%s1313_s15 + $0x70] sm:$0xff] %v565_v62 }
 0x24c   : > { %632 = vmatmul.f32.gmra.mxu2 %v471_v61 }
 0x24f   : > { %v568_v63 = vpop.f32.mrf.mxu3 }
 0x250   : > { %651 = vst [vmem:[%s1313_s15 + $0x78] sm:$0xff] %v568_v63 }
 0x257   : > { %v588_v0 = vpop.f32.mrf.mxu2 }
 0x258   : > { %652 = vst [vmem:[%s1313_s15 + $0x80] sm:$0xff] %v588_v0 }
 0x25f   : > { %v591_v1 = vpop.f32.mrf.mxu2 }
 0x260   : > { %653 = vst [vmem:[%s1313_s15 + $0x88] sm:$0xff] %v591_v1 }
 0x267   : > { %v594_v2 = vpop.f32.mrf.mxu2 }
 0x268   : > { %654 = vst [vmem:[%s1313_s15 + $0x90] sm:$0xff] %v594_v2 }
 0x26f   : > { %v597_v3 = vpop.f32.mrf.mxu2 }
 0x270   : > { %655 = vst [vmem:[%s1313_s15 + $0x98] sm:$0xff] %v597_v3 }
 0x277   : > { %v600_v4 = vpop.f32.mrf.mxu2 }
 0x278   : > { %656 = vst [vmem:[%s1313_s15 + $0xa0] sm:$0xff] %v600_v4 }
 0x27f   : > { %v603_v5 = vpop.f32.mrf.mxu2 }
 0x280   : > { %657 = vst [vmem:[%s1313_s15 + $0xa8] sm:$0xff] %v603_v5 }
 0x287   : > { %v606_v6 = vpop.f32.mrf.mxu2 }
 0x288   : > { %658 = vst [vmem:[%s1313_s15 + $0xb0] sm:$0xff] %v606_v6 }
 0x28f   : > { %v609_v7 = vpop.f32.mrf.mxu2 }
 0x290   : > { %659 = vst [vmem:[%s1313_s15 + $0xb8] sm:$0xff] %v609_v7 }
 0x297   : > { %v612_v8 = vpop.f32.mrf.mxu2 }
 0x298   : > { %660 = vst [vmem:[%s1313_s15 + $0xc0] sm:$0xff] %v612_v8 }
 0x29f   : > { %v615_v9 = vpop.f32.mrf.mxu2 }
 0x2a0   : > { %661 = vst [vmem:[%s1313_s15 + $0xc8] sm:$0xff] %v615_v9 }
 0x2a7   : > { %v618_v10 = vpop.f32.mrf.mxu2 }
 0x2a8   : > { %662 = vst [vmem:[%s1313_s15 + $0xd0] sm:$0xff] %v618_v10 }
 0x2af   : > { %v621_v11 = vpop.f32.mrf.mxu2 }
 0x2b0   : > { %663 = vst [vmem:[%s1313_s15 + $0xd8] sm:$0xff] %v621_v11 }
 0x2b7   : > { %v624_v12 = vpop.f32.mrf.mxu2 }
 0x2b8   : > { %664 = vst [vmem:[%s1313_s15 + $0xe0] sm:$0xff] %v624_v12 }
 0x2bf   : > { %v627_v13 = vpop.f32.mrf.mxu2 }
 0x2c0   : > { %665 = vst [vmem:[%s1313_s15 + $0xe8] sm:$0xff] %v627_v13 }
 0x2c7   : > { %v630_v14 = vpop.f32.mrf.mxu2 }
 0x2c8   : > { %666 = vst [vmem:[%s1313_s15 + $0xf0] sm:$0xff] %v630_v14 }
 0x2cf   : > { %v633_v15 = vpop.f32.mrf.mxu2 }
 0x2d0   : > { %667 = vst [vmem:[%s1313_s15 + $0xf8] sm:$0xff] %v633_v15 }
 0x2d1   : > { %991 = shalt.err (!%p988_p10)
}
 0x2d2   : > { %s1039_s5 = smov 128   ;;  %s1040_s30 = smov 8  }
 0x2d3   : > { %849 = dma.vmem_to_hbm [thread:$0]  (%p1125_p3), %s683_s17, 4096, %s685_s18, %s669_s19, %s1039_s5, %s1039_s5, %s1040_s30  }
 0x2d4 PF: > { %s699_s6 = sand.u32 1, %s1022_s9   ;;  %p1389_p12 = scmp.ge.s32.totalorder %s1034_s12, 2 }
 0x2d5   : > { %s700_s7 = scalar_lea.sflag [#allocation5], %s699_s6 }
 0x2d6   : > { %p860_p13 = pnand %p1389_p12, %p1091_p6 }
 0x2d8   : > { %p861_p0 = pneg %p860_p13 }
 0x2da   : > { %1017 = dma.done.wait (%p861_p0), %s700_s7, 4096  }
 0x2db   : > { %1019 = vsyncadd (%p861_p0), %s700_s7, 4294963200  ;;  %p16_p5 = scmp.ge.s32.totalorder %s1109_s23, 4   ;;  %s1390_s9 = smov %s1026_s10 }
 0x2dc   : > { %s1391_s10 = smov %s1030_s11  ;;  %s1392_s11 = smov %s1121_s28 }
 0x2dd   : > { %s1393_s12 = smov %s1109_s23  ;;  %18 = sbr.rel (!%p16_p5) target bundleno = 6 (0x6), region = 79 }
 0x2e2   :  { %706 = vsyncpa [#allocation4], 1 }
 0x2e3   :  { %708 = vsyncpa [#allocation4 + $0x1], 1 }
 0x2e4   :  { %709 = vsyncpa [#allocation7], 1 }
 0x2e5   :  { %711 = vsyncpa [#allocation7 + $0x1], 1 }
 0x2e6   :  { %712 = vsyncpa [#allocation5], 1 }
 0x2e7   :  { %714 = vsyncpa [#allocation5 + $0x1], 1 }

</bundles_post_ra>
